<compile_context>
chip_gen: v7x
topology: tpu7x:2x2x1
jax: 0.10.0
libtpu: 0.0.40
codegen_flags: <defaults>
</compile_context>

<pallas_src>
import functools

import jax
import jax.numpy as jnp
import numpy as np
from jax.experimental import pallas as pl
from jax.experimental.pallas import tpu as pltpu


def _round_up(x, m):
    return (x + m - 1) // m * m


def _cdiv(a, b):
    return -(-a // b)


# --------------------------------------------------------------------------
# Pallas kernel: one (TR, M) row-tile of weighted cross entropy.
#
# Inputs (per grid step i):
#   logits_ref  : (TR, M) logits tile in the input dtype (f32 or bf16).
#                 M is the full, unpadded class dim.  Rows whose global index
#                 is >= num_rows (overhang of the last tile) are undefined.
#   targets_ref : (TR, 1) int32 targets; undefined in masked rows.
# Output:
#   out_ref     : (1, 8, 128) f32 partial block; sublane 0 = sum(w*loss),
#                 sublane 1 = sum(w), rest zero.  Lane-dense unmasked store.
# --------------------------------------------------------------------------
def _wce_tile_kernel(logits_ref, targets_ref, out_ref, *,
                     inv_temp, bg_start, bg_weight, num_rows):
    x_raw = logits_ref[...]                        # input dtype (bf16 or f32)
    t = targets_ref[...]                           # (TR, 1) int32
    tr, m = x_raw.shape

    # Validity of each row in this tile, keyed on the GLOBAL row index so
    # undefined overhang rows of the last partial tile can never contribute
    # (neither through garbage targets nor NaN/Inf garbage logits).
    row = jax.lax.broadcasted_iota(jnp.int32, (tr, 1), 0)
    valid = (pl.program_id(0) * tr + row) < num_rows               # (TR, 1)

    # Target logit pulled from the raw tile (exactly one nonzero per row ->
    # exact in the input dtype), then upcast.  Avoids materializing a second
    # full-width (TR, M) f32 temporary.
    col = jax.lax.broadcasted_iota(jnp.int32, (tr, m), 1)
    hit = col == t                                                 # (TR, M)
    x_t = jnp.sum(jnp.where(hit, x_raw, 0), axis=1,
                  keepdims=True).astype(jnp.float32)               # (TR, 1)
    x_max = jnp.max(x_raw, axis=1, keepdims=True).astype(jnp.float32)

    # Cross entropy with the temperature folded into the stabilized exponent:
    #   loss = log(sum_j exp((x_j - x_max)*inv_temp)) - (x_t - x_max)*inv_temp
    s = (x_raw.astype(jnp.float32) - x_max) * jnp.float32(inv_temp)  # <= 0
    sum_exp = jnp.sum(jnp.exp(s), axis=1, keepdims=True)             # (TR, 1)
    per_row_loss = jnp.log(sum_exp) - (x_t - x_max) * jnp.float32(inv_temp)

    # Per-row class weight from the target index alone:
    #   t >= bg_start -> background prototype, weight bg_weight; else 1.
    # Invalid rows get weight 0, and their per-row loss is excluded via the
    # same mask (jnp.where selects 0 even if per_row_loss is NaN there).
    w = jnp.where(valid,
                  jnp.where(t >= bg_start, jnp.float32(bg_weight),
                            jnp.float32(1.0)),
                  jnp.float32(0.0))
    contrib = jnp.where(valid, w * per_row_loss, jnp.float32(0.0))

    loss_sum = jnp.sum(contrib)
    w_sum = jnp.sum(w)

    sub = jax.lax.broadcasted_iota(jnp.int32, out_ref.shape, 1)
    out_ref[...] = jnp.where(sub == 0, loss_sum,
                             jnp.where(sub == 1, w_sum, 0.0))


# --------------------------------------------------------------------------
# Wrapper: tile rows, launch, reduce per-tile partials.  No padding of the
# logits array (no extra HBM traffic).
# --------------------------------------------------------------------------
def weighted_ce_pallas(logits_2d, targets_1d, *, inv_temp, bg_start, bg_weight,
                       row_tile=1024):
    """Weighted-mean cross entropy (PyTorch F.cross_entropy w/ weight) on TPU."""
    r, m = logits_2d.shape

    # Row tile: multiple of 8, default 1024 so the ~0.35us/step grid overhead
    # is negligible against each step's DMA, while double-buffered f32 input
    # tiles stay ~8 MiB (safe for the 32 MiB scoped-VMEM limit set below).
    tr = min(int(row_tile), _round_up(r, 8))
    n_tiles = _cdiv(r, tr)
    if n_tiles > 1 and n_tiles % 2 == 1:
        # Best-effort even tile count so v7x's two TensorCores split evenly.
        tr_alt = _round_up(_cdiv(r, n_tiles + 1), 8)
        if tr_alt >= 8 and _cdiv(r, tr_alt) % 2 == 0:
            tr = tr_alt
            n_tiles = _cdiv(r, tr)

    targets_2d = targets_1d.astype(jnp.int32).reshape(r, 1)

    kernel = functools.partial(_wce_tile_kernel,
                               inv_temp=float(inv_temp),
                               bg_start=int(bg_start),
                               bg_weight=float(bg_weight),
                               num_rows=int(r))

    itemsize = jnp.dtype(logits_2d.dtype).itemsize
    cost = pl.CostEstimate(
        flops=6 * r * m,
        transcendentals=r * m,
        bytes_accessed=r * m * itemsize + r * 4 + n_tiles * 8 * 128 * 4)

    partials = pl.pallas_call(
        kernel,
        out_shape=jax.ShapeDtypeStruct((n_tiles, 8, 128), jnp.float32),
        grid=(n_tiles,),
        in_specs=[
            # Full-extent class axis (block dim == array dim, so no 128-
            # divisibility requirement and no wrapper-side pad).  If a profile
            # shows exposed per-step DMA, sweep pipeline_mode=pl.Buffered(3).
            pl.BlockSpec((tr, m), lambda i: (i, 0)),
            pl.BlockSpec((tr, 1), lambda i: (i, 0)),
        ],
        out_specs=pl.BlockSpec((1, 8, 128), lambda i: (i, 0, 0)),
        compiler_params=pltpu.CompilerParams(
            dimension_semantics=("parallel",),      # shards across v7x's 2 TCs
            vmem_limit_bytes=32 * 1024 * 1024),     # v5e's 16 MiB default is
                                                    # too tight for 1024-row tiles
        cost_estimate=cost,
    )(logits_2d, targets_2d)

    loss_sum = jnp.sum(partials[:, 0, 0])
    w_sum = jnp.sum(partials[:, 1, 0])
    # NOTE: returns NaN if every row has zero weight (matches PyTorch).
    return loss_sum / w_sum


def _plain_ce(logits, labels):
    # Tiny (B, C) unweighted CE: plain JAX (launch-overhead dominated; XLA
    # handles it as well as a dedicated kernel).
    logp = jax.nn.log_softmax(logits.astype(jnp.float32), axis=-1)
    nll = -jnp.take_along_axis(logp, labels.astype(jnp.int32)[:, None], axis=1)[:, 0]
    return jnp.mean(nll)


# --------------------------------------------------------------------------
# PNPCriterion.forward
# --------------------------------------------------------------------------
def pnp_criterion_forward(outputs, batch, *,
                          l_ppd_coef=0.0, l_ppd_temp=0.1,
                          num_classes=200, n_prototypes=5,
                          bg_class_weight=0.1, ppd_row_tile=1024):
    logits = outputs['class_logits']                 # (B, C)
    labels = batch['label']                          # (B,)

    loss_dict = {}
    loss_dict['l_y'] = _plain_ce(logits, labels)

    if l_ppd_coef != 0:
        ppl = outputs['patch_prototype_logits']      # (B, N, C+1, K), f32 or bf16
        pam = outputs['part_assignment_maps']        # (B, N)
        b, n, c_tot, k = ppl.shape
        # rearrange 'B N C K -> B (C K) N' + per-(b,n) CE  ==  (B*N, (C+1)*K)
        flat_logits = ppl.reshape(b * n, c_tot * k)
        flat_targets = pam.reshape(b * n)
        l_ppd = weighted_ce_pallas(
            flat_logits, flat_targets,
            inv_temp=1.0 / l_ppd_temp,
            bg_start=num_classes * n_prototypes,     # weight 1 below, bg_w above
            bg_weight=bg_class_weight,
            row_tile=ppd_row_tile)
        loss_dict['l_ppd'] = l_ppd_coef * l_ppd
        loss_dict['l_ppd_unadjusted'] = l_ppd

    return loss_dict


# --------------------------------------------------------------------------
# Pure-JAX reference (verification only)
# --------------------------------------------------------------------------
def _ref_weighted_ce(logits, targets, weight, inv_temp):
    x = logits.astype(jnp.float32) * inv_temp
    logp = jax.nn.log_softmax(x, axis=-1)
    per_row = -jnp.take_along_axis(logp, targets.astype(jnp.int32)[:, None], axis=1)[:, 0]
    w = weight[targets]
    return jnp.sum(w * per_row) / jnp.sum(w)


if __name__ == "__main__":
    base_key = jax.random.PRNGKey(0)

    def run_case(case_idx, B, N, C, K, bg_w, coef, temp, dtype, row_tile, tol):
        c_tot = C + 1
        k1, k2, k3, k4 = jax.random.split(jax.random.fold_in(base_key, case_idx), 4)
        class_logits = jax.random.normal(k1, (B, C), dtype=jnp.float32)
        ppl = jax.random.normal(k2, (B, N, c_tot, K), dtype=jnp.float32).astype(dtype)
        pam = jax.random.randint(k3, (B, N), 0, c_tot * K, dtype=jnp.int32)
        labels = jax.random.randint(k4, (B,), 0, C, dtype=jnp.int32)

        outputs = {'class_logits': class_logits,
                   'patch_prototype_logits': ppl,
                   'part_assignment_maps': pam}
        batch = {'label': labels}

        loss_dict = pnp_criterion_forward(
            outputs, batch, l_ppd_coef=coef, l_ppd_temp=temp,
            num_classes=C, n_prototypes=K, bg_class_weight=bg_w,
            ppd_row_tile=row_tile)
        loss_dict = jax.tree_util.tree_map(jax.block_until_ready, loss_dict)

        # references
        ref_l_y = _plain_ce(class_logits, labels)
        cw = jnp.concatenate([jnp.ones((C * K,), jnp.float32),
                              jnp.full((K,), bg_w, jnp.float32)])
        ref_l_ppd = _ref_weighted_ce(ppl.reshape(B * N, c_tot * K),
                                     pam.reshape(B * N), cw, 1.0 / temp)

        assert np.allclose(np.asarray(loss_dict['l_y']),
                           np.asarray(ref_l_y), rtol=tol, atol=tol)
        assert np.allclose(np.asarray(loss_dict['l_ppd_unadjusted']),
                           np.asarray(ref_l_ppd), rtol=tol, atol=tol)
        assert np.allclose(np.asarray(loss_dict['l_ppd']),
                           coef * np.asarray(ref_l_ppd), rtol=tol, atol=tol)

    # Case 1: tiny shapes, single tile, non-128-multiple class dim (18).
    run_case(1, B=2, N=16, C=8, K=2, bg_w=0.1, coef=0.5, temp=0.1,
             dtype=jnp.float32, row_tile=1024, tol=1e-4)
    # Case 2: multi-tile grid with a partial last tile (r=784, forced small
    # row tile) -> exercises in-kernel global-row masking and the even-tile
    # adjustment for megacore balance.
    run_case(2, B=4, N=196, C=16, K=3, bg_w=0.1, coef=0.5, temp=0.1,
             dtype=jnp.float32, row_tile=128, tol=1e-4)
    # Case 3: bf16 prototype logits (the recommended producer dtype); kernel
    # upcasts per tile, reference follows the same upcast path.
    run_case(3, B=2, N=64, C=12, K=2, bg_w=0.1, coef=0.5, temp=0.1,
             dtype=jnp.bfloat16, row_tile=48, tol=1e-3)

    print("KERNEL_OK")
</pallas_src>

<mosaic_0001>
module attributes {stable_mosaic.version = 11 : i64} {
  func.func @_wce_tile_kernel(%arg0: i32, %arg1: memref<32x18xf32, #tpu.memory_space<vmem>>, %arg2: memref<32x1xi32, #tpu.memory_space<vmem>>, %arg3: memref<1x8x128xf32, #tpu.memory_space<vmem>>) attributes {dimension_semantics = [#tpu.dimension_semantics<parallel>], iteration_bounds = array<i64: 1>, scalar_prefetch = 0 : i64, scratch_operands = 0 : i64, tpu.core_type = #tpu.core_type<tc>, window_params = [{transform_indices = @transform_0, window_bounds = array<i64: 32, 18>}, {transform_indices = @transform_1, window_bounds = array<i64: 32, 1>}, {transform_indices = @transform_2, window_bounds = array<i64: 1, 8, 128>}]} {
    %c0 = arith.constant 0 : index
    %c0_0 = arith.constant 0 : index
    %0 = vector.load %arg1[%c0, %c0_0] : memref<32x18xf32, #tpu.memory_space<vmem>>, vector<32x18xf32>
    %c0_1 = arith.constant 0 : index
    %c0_2 = arith.constant 0 : index
    %1 = vector.load %arg2[%c0_1, %c0_2] : memref<32x1xi32, #tpu.memory_space<vmem>>, vector<32x1xi32>
    %2 = tpu.iota {dimensions = array<i32: 0>} : vector<32x1xi32>
    %c32_i32 = arith.constant 32 : i32
    %3 = arith.muli %arg0, %c32_i32 : i32
    %4 = vector.broadcast %3 : i32 to vector<32x1xi32>
    %5 = arith.addi %4, %2 : vector<32x1xi32>
    %c32_i32_3 = arith.constant 32 : i32
    %6 = vector.broadcast %c32_i32_3 : i32 to vector<32x1xi32>
    %7 = arith.cmpi slt, %5, %6 : vector<32x1xi32>
    %8 = tpu.iota {dimensions = array<i32: 1>} : vector<32x18xi32>
    %9 = vector.broadcast %1 : vector<32x1xi32> to vector<32x18xi32>
    %10 = arith.cmpi eq, %8, %9 : vector<32x18xi32>
    %c0_i32 = arith.constant 0 : i32
    %11 = arith.sitofp %c0_i32 : i32 to f32
    %12 = vector.broadcast %11 : f32 to vector<32x18xf32>
    %13 = arith.select %10, %0, %12 : vector<32x18xi1>, vector<32x18xf32>
    %cst = arith.constant dense<0.000000e+00> : vector<32xf32>
    %14 = vector.multi_reduction <add>, %13, %cst [1] : vector<32x18xf32> to vector<32xf32>
    %15 = vector.shape_cast %14 : vector<32xf32> to vector<32x1xf32>
    %cst_4 = arith.constant dense<0xFF800000> : vector<32xf32>
    %16 = vector.multi_reduction <maximumf>, %0, %cst_4 [1] : vector<32x18xf32> to vector<32xf32>
    %17 = vector.shape_cast %16 : vector<32xf32> to vector<32x1xf32>
    %18 = vector.broadcast %17 : vector<32x1xf32> to vector<32x18xf32>
    %19 = arith.subf %0, %18 : vector<32x18xf32>
    %cst_5 = arith.constant 1.000000e+01 : f32
    %20 = vector.broadcast %cst_5 : f32 to vector<32x18xf32>
    %21 = arith.mulf %19, %20 : vector<32x18xf32>
    %22 = math.exp %21 : vector<32x18xf32>
    %cst_6 = arith.constant dense<0.000000e+00> : vector<32xf32>
    %23 = vector.multi_reduction <add>, %22, %cst_6 [1] : vector<32x18xf32> to vector<32xf32>
    %24 = vector.shape_cast %23 : vector<32xf32> to vector<32x1xf32>
    %25 = math.log %24 : vector<32x1xf32>
    %26 = arith.subf %15, %17 : vector<32x1xf32>
    %cst_7 = arith.constant 1.000000e+01 : f32
    %27 = vector.broadcast %cst_7 : f32 to vector<32x1xf32>
    %28 = arith.mulf %26, %27 : vector<32x1xf32>
    %29 = arith.subf %25, %28 : vector<32x1xf32>
    %c16_i32 = arith.constant 16 : i32
    %30 = vector.broadcast %c16_i32 : i32 to vector<32x1xi32>
    %31 = arith.cmpi sge, %1, %30 : vector<32x1xi32>
    %cst_8 = arith.constant 1.000000e-01 : f32
    %cst_9 = arith.constant 1.000000e+00 : f32
    %32 = vector.broadcast %cst_8 : f32 to vector<32x1xf32>
    %33 = vector.broadcast %cst_9 : f32 to vector<32x1xf32>
    %34 = arith.select %31, %32, %33 : vector<32x1xi1>, vector<32x1xf32>
    %cst_10 = arith.constant 0.000000e+00 : f32
    %35 = vector.broadcast %cst_10 : f32 to vector<32x1xf32>
    %36 = arith.select %7, %34, %35 : vector<32x1xi1>, vector<32x1xf32>
    %37 = arith.mulf %36, %29 : vector<32x1xf32>
    %cst_11 = arith.constant 0.000000e+00 : f32
    %38 = vector.broadcast %cst_11 : f32 to vector<32x1xf32>
    %39 = arith.select %7, %37, %38 : vector<32x1xi1>, vector<32x1xf32>
    %40 = vector.shape_cast %39 : vector<32x1xf32> to vector<1x32x1xf32>
    %cst_12 = arith.constant dense<0.000000e+00> : vector<1xf32>
    %41 = vector.multi_reduction <add>, %40, %cst_12 [1, 2] : vector<1x32x1xf32> to vector<1xf32>
    %42 = vector.shape_cast %41 : vector<1xf32> to vector<1x1x1xf32>
    %43 = vector.extract %42[0, 0, 0] : f32 from vector<1x1x1xf32>
    %44 = vector.shape_cast %36 : vector<32x1xf32> to vector<1x32x1xf32>
    %cst_13 = arith.constant dense<0.000000e+00> : vector<1xf32>
    %45 = vector.multi_reduction <add>, %44, %cst_13 [1, 2] : vector<1x32x1xf32> to vector<1xf32>
    %46 = vector.shape_cast %45 : vector<1xf32> to vector<1x1x1xf32>
    %47 = vector.extract %46[0, 0, 0] : f32 from vector<1x1x1xf32>
    %48 = tpu.iota {dimensions = array<i32: 1>} : vector<1x8x128xi32>
    %c0_i32_14 = arith.constant 0 : i32
    %49 = vector.broadcast %c0_i32_14 : i32 to vector<1x8x128xi32>
    %50 = arith.cmpi eq, %48, %49 : vector<1x8x128xi32>
    %c1_i32 = arith.constant 1 : i32
    %51 = vector.broadcast %c1_i32 : i32 to vector<1x8x128xi32>
    %52 = arith.cmpi eq, %48, %51 : vector<1x8x128xi32>
    %cst_15 = arith.constant 0.000000e+00 : f32
    %53 = vector.broadcast %47 : f32 to vector<1x8x128xf32>
    %54 = vector.broadcast %cst_15 : f32 to vector<1x8x128xf32>
    %55 = arith.select %52, %53, %54 : vector<1x8x128xi1>, vector<1x8x128xf32>
    %56 = vector.broadcast %43 : f32 to vector<1x8x128xf32>
    %57 = arith.select %50, %56, %55 : vector<1x8x128xi1>, vector<1x8x128xf32>
    %c0_16 = arith.constant 0 : index
    %c0_17 = arith.constant 0 : index
    %c0_18 = arith.constant 0 : index
    %58 = vector.load %arg3[%c0_16, %c0_17, %c0_18] : memref<1x8x128xf32, #tpu.memory_space<vmem>>, vector<1x8x128xf32>
    tpu.vector_store %arg3[%c0_16, %c0_17, %c0_18], %57 {strides = array<i32>} : memref<1x8x128xf32, #tpu.memory_space<vmem>>, vector<1x8x128xf32>,
    return
  }
  func.func @transform_0(%arg0: i32) -> (i32, i32) {
    %c0_i32 = arith.constant 0 : i32
    %c0_i32_0 = arith.constant 0 : i32
    return %arg0, %c0_i32 : i32, i32
  }
  func.func @transform_1(%arg0: i32) -> (i32, i32) {
    %c0_i32 = arith.constant 0 : i32
    %c0_i32_0 = arith.constant 0 : i32
    return %arg0, %c0_i32 : i32, i32
  }
  func.func @transform_2(%arg0: i32) -> (i32, i32, i32) {
    %c0_i32 = arith.constant 0 : i32
    %c0_i32_0 = arith.constant 0 : i32
    %c0_i32_1 = arith.constant 0 : i32
    return %arg0, %c0_i32, %c0_i32_0 : i32, i32, i32
  }
}

</mosaic_0001>

<bundles_post_ra>
// kernel: tpu_custom_call.1
= control target key start
LH: loop header
LB: loop body
LE: loop exit
PB: predicated region body
PF: predicated region fallthrough
CT: control target
= control target key end

     0   :  { %vm57_vm0 = vcmask 146432   ;;  %v253_v6 = vmov 0   ;;  %s376_s0 = inlined_call_operand.vmem [shape: f32[32,18], index: 0, kind: input, shape index: {}]   ;;  %s377_s1 = inlined_call_operand.vmem [shape: s32[32,1], index: 1, kind: input, shape index: {}]   ;;  %s378_s2 = inlined_call_operand.hbm [shape: f32[1,8,128], index: 2, kind: output, shape index: {}]  }
   0x1   :  { %v274_v0 = vld [vmem:[%s376_s0] sm:$0xff]  ;;  %v14_v1 = vld [vmem:[%s376_s0 + $0x10] sm:$0xff]  ;;  %v282_v2 = vld [vmem:[%s376_s0 + $0x8] sm:$0xff]  ;;  %212 = vset.pattern.permute.xlu1 %v253_v6  ;;  %211 = vset.pattern.permute.xlu0 %v253_v6 }
   0x2   :  { %v70_v3 = vsel %vm57_vm0, %v274_v0, -inf  ;;  %v76_v4 = vsel %vm57_vm0, %v14_v1, -inf  ;;  %v290_v5 = vld [vmem:[%s376_s0 + $0x18] sm:$0xff]  ;;  %v73_v7 = vsel %vm57_vm0, %v282_v2, -inf }
   0x3   :  { %71 = vmax.xlane.f32.xlu0 %v70_v3  ;;  %77 = vmax.xlane.f32.xlu1 %v76_v4  ;;  %v79_v8 = vsel %vm57_vm0, %v290_v5, -inf }
   0x4   :  { %7 = vsyncpa [#allocation3], 0  ;;  %v299_v9 = vld [vmem:[%s377_s1 + $0x8] sm:$0xff]  ;;  %v305_v10 = vld [vmem:[%s377_s1 + $0x10] sm:$0xff]  ;;  %v20_v30 = vlaneseq  ;;  %v254_v51 = vmov 1.0   ;;  %vm150_vm7 = vcmask 7168  }
   0x5   :  { %v310_v11 = vld [vmem:[%s377_s1] sm:$0xff]  ;;  %v316_v12 = vld [vmem:[%s377_s1 + $0x18] sm:$0xff]  ;;  %vm131_vm5 = vcmp.ge.s32.totalorder %v299_v9, 16  ;;  %vm132_vm8 = vcmp.ge.s32.totalorder %v305_v10, 16  ;;  %s255_s24 = smov [#allocation2]  }
   0x6   :  { %v36_v31 = vand.u32 127, %v20_v30  ;;  %vm130_vm6 = vcmp.ge.s32.totalorder %v310_v11, 16  ;;  %v135_v52 = vsel %vm131_vm5, 0.1, %v254_v51  ;;  %v136_v56 = vsel %vm132_vm8, 0.1, %v254_v51 }
   0x7   :  { %74 = vmax.xlane.f32.xlu0 %v73_v7  ;;  %80 = vmax.xlane.f32.xlu1 %v79_v8  ;;  %v134_v53 = vsel %vm130_vm6, 0.1, %v254_v51  ;;  %v168_v54 = vsel %vm150_vm7, %v135_v52, 0.0  ;;  %vm133_vm9 = vcmp.ge.s32.totalorder %v316_v12, 16  ;;  %v170_v58 = vsel %vm150_vm7, %v136_v56, 0.0  ;;  %s196_s25 = sshll.u32 %s255_s24, 4  ;;  %s197_s25 = int_to_ptr.vmem [resolvable:$true] %s196_s25 }
   0x8   :  { %v167_v55 = vsel %vm150_vm7, %v134_v53, 0.0  ;;  %v137_v59 = vsel %vm133_vm9, 0.1, %v254_v51  ;;  %s229_s27 = scalar_lea.vmem %s197_s25, 128  ;;  %p234_p1 = scmp.lt.s32.totalorder %s197_s25, %s197_s25 }
   0x9   :  { %v169_v57 = vadd.f32 %v168_v54, %v167_v55  ;;  %v172_v61 = vsel %vm150_vm7, %v137_v59, 0.0  ;;  %p230_p0 = scmp.ne.s32.totalorder %s197_s25, %s229_s27  ;;  %p235_p2 = scmp.lt.s32.totalorder %s229_s27, %s229_s27 }
   0xb   :  { %v171_v60 = vadd.f32 %v170_v58, %v169_v57  ;;  %p236_p3 = por %p235_p2, %p234_p1 }
   0xd   :  { %v173_v62 = vadd.f32 %v172_v61, %v171_v60  ;;  %p237_p4 = pnand %p236_p3, %p230_p0 }
  0x18   :  { %41 = vperm.xlu1 %212, %v299_v9  }
  0x1c   :  { %44 = vperm.xlu1 %212, %v305_v10  }
  0x1d   :  { %38 = vperm.xlu0 %211, %v310_v11  }
  0x20   :  { %47 = vperm.xlu1 %212, %v316_v12  }
  0x90   :  { %v320_v13 = vpop.xlane.xlu0 %71  ;;  %v322_v14 = vpop.xlane.xlu1 %77 }
  0x91   :  { %v82_v15 = vsub.f32 %v274_v0, %v320_v13  ;;  %v84_v16 = vsub.f32 %v14_v1, %v322_v14 }
  0x93   :  { %v86_v17 = vmul.f32 10.0, %v82_v15  ;;  %v88_v18 = vmul.f32 10.0, %v84_v16 }
  0x94   :  { %v327_v19 = vpop.xlane.xlu0 %74  ;;  %v329_v20 = vpop.xlane.xlu1 %80 }
  0x95   :  { %v90_v21 = vmul.f32 1.442695, %v86_v17  ;;  %v94_v22 = vmul.f32 1.442695, %v88_v18  ;;  %v83_v23 = vsub.f32 %v282_v2, %v327_v19  ;;  %v85_v24 = vsub.f32 %v290_v5, %v329_v20 }
  0x97   :  { %213 = vpow2.f32 %v90_v21  ;;  %v87_v25 = vmul.f32 10.0, %v83_v23  ;;  %v89_v26 = vmul.f32 10.0, %v85_v24 }
  0x98   :  { %215 = vpow2.f32 %v94_v22  ;;  %v42_v29 = vpop.permute.xlu1 %41 }
  0x99   :  { %v92_v27 = vmul.f32 1.442695, %v87_v25  ;;  %v96_v28 = vmul.f32 1.442695, %v89_v26  ;;  %vm50_vm3 = vcmp.eq.s32.totalorder %v36_v31, %v42_v29 }
  0x9a   :  { %v54_v47 = vsel %vm50_vm3, %v282_v2, 0.0 }
  0x9b   :  { %217 = vpow2.f32 %v92_v27  ;;  %v61_v48 = vsel %vm57_vm0, %v54_v47, 0.0 }
  0x9c   :  { %219 = vpow2.f32 %v96_v28  ;;  %v45_v32 = vpop.permute.xlu1 %44  ;;  %v39_v36 = vpop.permute.xlu0 %38 }
  0x9d   :  { %vm51_vm1 = vcmp.eq.s32.totalorder %v36_v31, %v45_v32  ;;  %vm49_vm2 = vcmp.eq.s32.totalorder %v36_v31, %v39_v36 }
  0x9e   :  { %v55_v39 = vsel %vm51_vm1, %v14_v1, 0.0  ;;  %v53_v44 = vsel %vm49_vm2, %v274_v0, 0.0 }
  0x9f   :  { %v64_v43 = vsel %vm57_vm0, %v55_v39, 0.0  ;;  %v58_v45 = vsel %vm57_vm0, %v53_v44, 0.0 }
  0xa0   :  { %v48_v46 = vpop.permute.xlu1 %47 }
  0xa1   :  { %v214_v33 = vpop.eup %213  ;;  %vm52_vm4 = vcmp.eq.s32.totalorder %v36_v31, %v48_v46 }
  0xa2   :  { %v216_v34 = vpop.eup %215  ;;  %v98_v35 = vsel %vm57_vm0, %v214_v33, 0.0  ;;  %v56_v49 = vsel %vm52_vm4, %v290_v5, 0.0 }
  0xa3   :  { %99 = vadd.xlane.f32.xlu1 %v98_v35  ;;  %v104_v37 = vsel %vm57_vm0, %v216_v34, 0.0  ;;  %v67_v50 = vsel %vm57_vm0, %v56_v49, 0.0 }
  0xa5   :  { %v218_v38 = vpop.eup %217 }
  0xa6   :  { %v220_v40 = vpop.eup %219  ;;  %v101_v41 = vsel %vm57_vm0, %v218_v38, 0.0 }
  0xa7   :  { %105 = vadd.xlane.f32.xlu1 %v104_v37  ;;  %102 = vadd.xlane.f32.xlu0 %v101_v41  ;;  %v107_v42 = vsel %vm57_vm0, %v220_v40, 0.0 }
  0xab   :  { %108 = vadd.xlane.f32.xlu1 %v107_v42  ;;  %65 = vadd.xlane.f32.xlu0 %v64_v43 }
  0xaf   :  { %59 = vadd.xlane.f32.xlu1 %v58_v45 }
  0xb3   :  { %62 = vadd.xlane.f32.xlu1 %v61_v48 }
  0xb7   :  { %68 = vadd.xlane.f32.xlu1 %v67_v50 }
  0xbb   :  { %174 = vadd.xlane.f32.xlu1 %v173_v62 }
 0x130   :  { %v100_v63 = vpop.xlane.xlu1 %99 }
 0x131   :  { %221 = vlog2.f32 %v100_v63 }
 0x134   :  { %v106_v0 = vpop.xlane.xlu1 %105  ;;  %v103_v1 = vpop.xlane.xlu0 %102 }
 0x135   :  { %223 = vlog2.f32 %v106_v0 }
 0x136   :  { %225 = vlog2.f32 %v103_v1 }
 0x138   :  { %v109_v2 = vpop.xlane.xlu1 %108  ;;  %v66_v3 = vpop.xlane.xlu0 %65 }
 0x139   :  { %227 = vlog2.f32 %v109_v2  ;;  %v120_v6 = vsub.f32 %v66_v3, %v322_v14 }
 0x13b   :  { %v222_v4 = vpop.eup %221  ;;  %v124_v17 = vmul.f32 10.0, %v120_v6 }
 0x13c   :  { %v60_v5 = vpop.xlane.xlu1 %59  ;;  %v111_v9 = vmul.f32 0.6931472, %v222_v4 }
 0x13d   :  { %v118_v7 = vsub.f32 %v60_v5, %v320_v13 }
 0x13f   :  { %v224_v8 = vpop.eup %223  ;;  %v122_v10 = vmul.f32 10.0, %v118_v7 }
 0x140   :  { %v226_v11 = vpop.eup %225  ;;  %v115_v12 = vmul.f32 0.6931472, %v224_v8  ;;  %v63_v15 = vpop.xlane.xlu1 %62 }
 0x141   :  { %v113_v16 = vmul.f32 0.6931472, %v226_v11  ;;  %v126_v18 = vsub.f32 %v111_v9, %v122_v10  ;;  %v119_v21 = vsub.f32 %v63_v15, %v327_v19 }
 0x142   :  { %v128_v22 = vsub.f32 %v115_v12, %v124_v17 }
 0x143   :  { %v123_v23 = vmul.f32 10.0, %v119_v21  ;;  %v228_v24 = vpop.eup %227  ;;  %v142_v26 = vmul.f32 %v134_v53, %v126_v18  ;;  %v21_v53 = vshrl.u32 %v20_v30, 7 }
 0x144   :  { %v69_v25 = vpop.xlane.xlu1 %68  ;;  %v117_v13 = vmul.f32 0.6931472, %v228_v24  ;;  %v144_v28 = vmul.f32 %v136_v56, %v128_v22 }
 0x145   :  { %v127_v27 = vsub.f32 %v113_v16, %v123_v23  ;;  %v121_v14 = vsub.f32 %v69_v25, %v329_v20  ;;  %v151_v33 = vsel %vm150_vm7, %v142_v26, 0.0  ;;  %vm184_vm10 = vcmp.eq.s32.totalorder %v21_v53, 1 }
 0x146   :  { %v154_v19 = vsel %vm150_vm7, %v144_v28, 0.0  ;;  %vm183_vm11 = vcmp.eq.s32.totalorder %v21_v53, 0 }
 0x147   :  { %v143_v29 = vmul.f32 %v135_v52, %v127_v27  ;;  %v125_v31 = vmul.f32 10.0, %v121_v14 }
 0x148   :  { %v175_v40 = vpop.xlane.xlu1 %174 }
 0x149   :  { %v129_v32 = vsub.f32 %v117_v13, %v125_v31  ;;  %v152_v34 = vsel %vm150_vm7, %v143_v29, 0.0  ;;  %v176_v20 = vrot.slane %v175_v40, 4 }
 0x14a   :  { %v153_v35 = vadd.f32 %v152_v34, %v151_v33 }
 0x14b   :  { %v145_v36 = vmul.f32 %v137_v59, %v129_v32  ;;  %v177_v41 = vadd.f32 %v176_v20, %v175_v40 }
 0x14c   :  { %v155_v37 = vadd.f32 %v154_v19, %v153_v35 }
 0x14d   :  { %v156_v38 = vsel %vm150_vm7, %v145_v36, 0.0  ;;  %v178_v42 = vrot.slane %v177_v41, 2 }
 0x14e   :  { %v157_v39 = vadd.f32 %v156_v38, %v155_v37 }
 0x14f   :  { %v179_v46 = vadd.f32 %v178_v42, %v177_v41 }
 0x150   :  { %158 = vadd.xlane.f32.xlu0 %v157_v39 }
 0x151   :  { %v180_v49 = vrot.slane %v179_v46, 1 }
 0x153   :  { %v181_v52 = vadd.f32 %v180_v49, %v179_v46 }
 0x1dd   :  { %v159_v43 = vpop.xlane.xlu0 %158 }
 0x1de   :  { %v160_v44 = vrot.slane %v159_v43, 4 }
 0x1e0   :  { %v161_v45 = vadd.f32 %v160_v44, %v159_v43 }
 0x1e2   :  { %v162_v47 = vrot.slane %v161_v45, 2 }
 0x1e4   :  { %v163_v48 = vadd.f32 %v162_v47, %v161_v45 }
 0x1e6   :  { %v164_v50 = vrot.slane %v163_v48, 1 }
 0x1e8   :  { %v165_v51 = vadd.f32 %v164_v50, %v163_v48 }
 0x1ea   :  { %204 = vpush %v165_v51 }
 0x1eb   :  { %206 = vpush %v181_v52 }
 0x21b   :  { %s205_s1 = spop %204 }
 0x21c   :  { %v187_v54 = vstv %s205_s1  ;;  %s207_s26 = spop %206 }
 0x21d   :  { %v185_v55 = vstv %s207_s26 }
 0x21e   :  { %v186_v56 = vsel %vm184_vm10, %v185_v55, 0.0 }
 0x21f   :  { %v188_v57 = vsel %vm183_vm11, %v187_v54, %v186_v56 }
 0x220   :  { %189 = vst [vmem:[#allocation2] sm:$0xff] %v188_v57 }
 0x221   :  { %240 = shalt.err (!%p237_p4)
}
 0x222   :  { %s241_s30 = scalar_lea.hbm %s378_s2, 128 }
 0x223   :  { %p242_p5 = scmp.ne.s32.totalorder %s378_s2, %s241_s30  ;;  %p245_p6 = scmp.lt.u32.totalorder %s241_s30, %s378_s2 }
 0x225   :  { %p247_p7 = pnand %p245_p6, %p242_p5 }
 0x227   :  { %250 = shalt.err (!%p247_p7)
}
 0x228   :  { %199 = dma.vmem_to_hbm [thread:$0]  %s197_s25, 128, %s378_s2, [#allocation3]  }
 0x229   :  { %251 = dma.done.wait [#allocation3], 128  }
 0x22a   :  { %252 = vsyncadd [#allocation3], 4294967168 }
 0x22b   :  { %203 = vsyncpa [#allocation3], 1 }

</bundles_post_ra>
